<compile_context>
chip_gen: v7x
topology: tpu7x:2x2x1
jax: 0.10.0
libtpu: 0.0.40
codegen_flags: <defaults>
</compile_context>

<pallas_src>
import functools

import numpy as np
import jax
import jax.numpy as jnp
from jax.experimental import pallas as pl
from jax.experimental.pallas import tpu as pltpu


# ----------------------------------------------------------------------------
# Kernels
# ----------------------------------------------------------------------------
def _noop_kernel(x_ref, o_ref):
    # Output aliases the input buffer; there is nothing to move.  touch()
    # pins a fake read+write dependency so the aliased output "materializes".
    del x_ref
    pltpu.touch(o_ref)


def _copy_kernel(x_ref, o_ref):
    # Streaming copy of one lane-dense tile (secondary, materializing path).
    o_ref[...] = x_ref[...]


# ----------------------------------------------------------------------------
# Primary path: zero-DMA aliased no-op
# ----------------------------------------------------------------------------
def _noop_pallas_call(x: jax.Array) -> jax.Array:
    return pl.pallas_call(
        _noop_kernel,
        out_shape=jax.ShapeDtypeStruct(x.shape, x.dtype),
        in_specs=[pl.BlockSpec(memory_space=pl.ANY)],   # leave in HBM, no auto-DMA
        out_specs=pl.BlockSpec(memory_space=pl.ANY),
        input_output_aliases={0: 0},                    # output IS the input buffer
        compiler_params=pltpu.CompilerParams(has_side_effects=True),
    )(x)


# ----------------------------------------------------------------------------
# Secondary path: tiled, double-buffered streaming copy (fresh output buffer)
# ----------------------------------------------------------------------------
_LANES = 1024              # lane-dense width: multiple of 128 -> unmasked vst
_MAX_TILE_BYTES = 8 << 20  # per-buffer tile target (review: 8 MiB on v6e/v7x)


@functools.lru_cache(maxsize=None)
def _tpu_vmem_bytes() -> int:
    try:
        return int(pltpu.get_tpu_info().vmem_capacity_bytes)
    except Exception:
        return 64 << 20  # v7x per-TC VMEM: the most conservative current part


def _sublane_align(itemsize: int) -> int:
    # Second-minor packing tile: 8 rows for 4-byte, 16 for bf16, 32 for int8/fp8.
    return max(8, 32 // max(1, itemsize))


def _tiled_copy_2d(x2d: jax.Array) -> jax.Array:
    rows, lanes = x2d.shape
    itemsize = x2d.dtype.itemsize
    vmem = _tpu_vmem_bytes()

    # Fixed, dtype-aligned row tile; pl.cdiv grid handles a ragged last block,
    # so there is never a whole-array fallback block.
    tile_bytes = min(_MAX_TILE_BYTES, max(2 << 20, vmem // 8))
    align = _sublane_align(itemsize)
    target = max(align, (tile_bytes // (lanes * itemsize)) // align * align)
    tile_r = rows if rows <= target else target
    grid = (pl.cdiv(rows, tile_r),)

    # 2 in + 2 out buffers at tile_bytes each; raise the scoped VMEM limit
    # explicitly (v5e default 16 MiB / v6e 32 MiB), stay under v7x's 64 MiB.
    vmem_limit = min(48 << 20, (vmem * 3) // 4)

    return pl.pallas_call(
        _copy_kernel,
        out_shape=jax.ShapeDtypeStruct(x2d.shape, x2d.dtype),
        grid=grid,
        in_specs=[pl.BlockSpec((tile_r, lanes), lambda i: (i, 0))],
        out_specs=pl.BlockSpec((tile_r, lanes), lambda i: (i, 0)),
        compiler_params=pltpu.CompilerParams(
            dimension_semantics=("parallel",),  # shard grid across v7x's 2 TCs
            vmem_limit_bytes=vmem_limit,
        ),
    )(x2d)


def _small_copy_2d(x2d: jax.Array) -> jax.Array:
    # Remainder (< _LANES elements): one tiny full-extent block (<= ~32 KiB in
    # VMEM after padding) -- never a large un-gridded block.
    return pl.pallas_call(
        _copy_kernel,
        out_shape=jax.ShapeDtypeStruct(x2d.shape, x2d.dtype),
    )(x2d)


def _pallas_copy_identity(x: jax.Array) -> jax.Array:
    """Materializes a fresh copy of x (kept for callers that need a new buffer)."""
    if x.size == 0:
        return x
    orig_shape = x.shape
    flat = x.reshape(-1)
    n = flat.shape[0]
    n_main = (n // _LANES) * _LANES

    parts = []
    if n_main:
        main = flat[:n_main].reshape(n_main // _LANES, _LANES)
        parts.append(_tiled_copy_2d(main).reshape(-1))
    if n > n_main:
        rem = flat[n_main:].reshape(1, n - n_main)
        parts.append(_small_copy_2d(rem).reshape(-1))
    out = parts[0] if len(parts) == 1 else jnp.concatenate(parts)
    return out.reshape(orig_shape)


# ----------------------------------------------------------------------------
# Forward-pass identity
# ----------------------------------------------------------------------------
_NOOP_PATH_OK = None  # None = untried, then True/False after the first eager call


def _pallas_identity(x: jax.Array) -> jax.Array:
    """Identity on x: zero-DMA aliased no-op, with a streaming-copy safety net."""
    global _NOOP_PATH_OK
    if x.size == 0:
        return x
    if _NOOP_PATH_OK is not False:
        try:
            y = _noop_pallas_call(x)
            _NOOP_PATH_OK = True
            return y
        except Exception:
            # Safety net for environments where the ANY-space no-op does not
            # lower; keeps the module functional via the streaming copy.
            _NOOP_PATH_OK = False
    return _pallas_copy_identity(x)


class YoloLayer:
    """JAX/Pallas equivalent of the PyTorch YoloLayer module.

    No parameters.  forward(x) -> {name: x}; the tensor is routed through a
    zero-data-movement Pallas identity (the dict wrapping is host-level).
    """

    def __init__(self, name: str):
        self.name = name

    def __call__(self, x: jax.Array) -> dict:
        return {self.name: _pallas_identity(x)}

    forward = __call__


# ----------------------------------------------------------------------------
# Demo / self-test
# ----------------------------------------------------------------------------
if __name__ == "__main__":
    key = jax.random.PRNGKey(0)
    # Small NCHW feature map consistent with a YOLO detection-head input.
    x = jax.random.normal(key, (2, 4, 16, 16), dtype=jnp.float32)
    x_np = np.asarray(x)  # host snapshot (the no-op output aliases x's buffer)

    # (a) Secondary materializing copy path (exercised first; no aliasing).
    y_copy = _pallas_copy_identity(x)
    jax.block_until_ready(y_copy)
    assert np.array_equal(np.asarray(y_copy), x_np)

    # (b) Odd-sized tensor exercises the small-remainder handling.
    x_odd = jax.random.normal(jax.random.PRNGKey(1), (3, 5, 7), dtype=jnp.float32)
    x_odd_np = np.asarray(x_odd)
    y_odd = _pallas_copy_identity(x_odd)
    jax.block_until_ready(y_odd)
    assert np.array_equal(np.asarray(y_odd), x_odd_np)

    # (c) Primary zero-DMA no-op path through the module itself.
    layer = YoloLayer("yolo_0")
    out = layer(x)
    y = out["yolo_0"]
    jax.block_until_ready(y)

    assert set(out.keys()) == {"yolo_0"}
    assert y.shape == x_np.shape and y.dtype == x_np.dtype
    assert np.array_equal(np.asarray(y), x_np)

    print("KERNEL_OK")
</pallas_src>

<mosaic_0001>
module attributes {stable_mosaic.version = 11 : i64} {
  func.func @_copy_kernel(%arg0: i32, %arg1: memref<2x1024xf32, #tpu.memory_space<vmem>>, %arg2: memref<2x1024xf32, #tpu.memory_space<vmem>>) attributes {dimension_semantics = [#tpu.dimension_semantics<parallel>], iteration_bounds = array<i64: 1>, scalar_prefetch = 0 : i64, scratch_operands = 0 : i64, tpu.core_type = #tpu.core_type<tc>, window_params = [{transform_indices = @transform_0, window_bounds = array<i64: 2, 1024>}, {transform_indices = @transform_1, window_bounds = array<i64: 2, 1024>}]} {
    %c0 = arith.constant 0 : index
    %c0_0 = arith.constant 0 : index
    %0 = vector.load %arg1[%c0, %c0_0] : memref<2x1024xf32, #tpu.memory_space<vmem>>, vector<2x1024xf32>
    %c0_1 = arith.constant 0 : index
    %c0_2 = arith.constant 0 : index
    %1 = vector.load %arg2[%c0_1, %c0_2] : memref<2x1024xf32, #tpu.memory_space<vmem>>, vector<2x1024xf32>
    tpu.vector_store %arg2[%c0_1, %c0_2], %0 {strides = array<i32>} : memref<2x1024xf32, #tpu.memory_space<vmem>>, vector<2x1024xf32>,
    return
  }
  func.func @transform_0(%arg0: i32) -> (i32, i32) {
    %c0_i32 = arith.constant 0 : i32
    %c0_i32_0 = arith.constant 0 : i32
    return %arg0, %c0_i32 : i32, i32
  }
  func.func @transform_1(%arg0: i32) -> (i32, i32) {
    %c0_i32 = arith.constant 0 : i32
    %c0_i32_0 = arith.constant 0 : i32
    return %arg0, %c0_i32 : i32, i32
  }
}

</mosaic_0001>

<bundles_post_ra>
// kernel: tpu_custom_call.1
= control target key start
LH: loop header
LB: loop body
LE: loop exit
PB: predicated region body
PF: predicated region fallthrough
CT: control target
= control target key end

     0   :  { %6 = vsyncpa [#allocation3], 0  ;;  %s126_s0 = inlined_call_operand.hbm [shape: f32[2,1024], index: 0, kind: input, shape index: {}]   ;;  %s127_s1 = inlined_call_operand.hbm [shape: f32[2,1024], index: 1, kind: output, shape index: {}]  }
   0x1   :  { %7 = vsyncpa [#allocation4], 0  ;;  %s90_s6 = smov [#allocation2]   ;;  %s42_s10 = scalar_lea.hbm %s126_s0, 256 }
   0x2   :  { %s14_s7 = sshll.u32 %s90_s6, 4  ;;  %p43_p0 = scmp.ne.s32.totalorder %s126_s0, %s42_s10  ;;  %s15_s7 = int_to_ptr.vmem [resolvable:$true] %s14_s7 }
   0x3   :  { %p46_p1 = scmp.lt.u32.totalorder %s42_s10, %s126_s0 }
   0x5   :  { %p48_p2 = pnand %p46_p1, %p43_p0 }
   0x7   :  { %51 = shalt.err (!%p48_p2)
}
   0x8   :  { %s52_s15 = scalar_lea.vmem %s15_s7, 256  ;;  %p57_p4 = scmp.lt.s32.totalorder %s15_s7, %s15_s7 }
   0x9   :  { %p53_p3 = scmp.ne.s32.totalorder %s15_s7, %s52_s15  ;;  %p58_p5 = scmp.lt.s32.totalorder %s52_s15, %s52_s15 }
   0xb   :  { %p59_p6 = por %p58_p5, %p57_p4 }
   0xd   :  { %p60_p7 = pnand %p59_p6, %p53_p3 }
   0xf   :  { %63 = shalt.err (!%p60_p7)
}
  0x10   :  { %17 = dma.hbm_to_vmem [thread:$0]  %s126_s0, 256, %s15_s7, [#allocation3]  }
  0x11   :  { %86 = dma.done.wait [#allocation3], 256  }
  0x12   :  { %87 = vsyncadd [#allocation3], 4294967040  ;;  %s91_s18 = smov [#allocation5]   ;;  %v21_v0 = vld [vmem:[#allocation2] sm:$0xff]  ;;  %v22_v1 = vld [vmem:[#allocation2 + $0x8] sm:$0xff] }
  0x13   :  { %s31_s19 = sshll.u32 %s91_s18, 4  ;;  %23 = vst [vmem:[#allocation5] sm:$0xff] %v21_v0  ;;  %24 = vst [vmem:[#allocation5 + $0x8] sm:$0xff] %v22_v1  ;;  %s32_s19 = int_to_ptr.vmem [resolvable:$true] %s31_s19 }
  0x14   :  { %s64_s20 = scalar_lea.vmem %s32_s19, 256  ;;  %p69_p9 = scmp.lt.s32.totalorder %s32_s19, %s32_s19 }
  0x15   :  { %p65_p8 = scmp.ne.s32.totalorder %s32_s19, %s64_s20  ;;  %p70_p10 = scmp.lt.s32.totalorder %s64_s20, %s64_s20 }
  0x17   :  { %p71_p11 = por %p70_p10, %p69_p9 }
  0x19   :  { %p72_p12 = pnand %p71_p11, %p65_p8 }
  0x1b   :  { %75 = shalt.err (!%p72_p12)
}
  0x1c   :  { %s76_s0 = scalar_lea.hbm %s127_s1, 256 }
  0x1d   :  { %p77_p13 = scmp.ne.s32.totalorder %s127_s1, %s76_s0  ;;  %p80_p0 = scmp.lt.u32.totalorder %s76_s0, %s127_s1 }
  0x1f   :  { %p82_p1 = pnand %p80_p0, %p77_p13 }
  0x21   :  { %85 = shalt.err (!%p82_p1)
}
  0x22   :  { %34 = dma.vmem_to_hbm [thread:$0]  %s32_s19, 256, %s127_s1, [#allocation4]  }
  0x23   :  { %88 = dma.done.wait [#allocation4], 256  }
  0x24   :  { %89 = vsyncadd [#allocation4], 4294967040 }
  0x25   :  { %38 = vsyncpa [#allocation3], 1 }
  0x26   :  { %39 = vsyncpa [#allocation4], 1 }

</bundles_post_ra>
